<compile_context>
chip_gen: v7x
topology: tpu7x:2x2x1
jax: 0.10.0
libtpu: 0.0.40
codegen_flags: <defaults>
</compile_context>

<pallas_src>
import jax
import jax.numpy as jnp
import numpy as np
from jax.experimental import pallas as pl
from jax.experimental.pallas import tpu as pltpu


def _round_up(n: int, m: int) -> int:
    return ((n + m - 1) // m) * m


def make_delta_kernel(P: int, use_residual: bool):
    """Single fused matmul + LSTM-cell nonlinearities (+ residual add).

    Every gate slab is P = round_up(H, 128) lanes wide, so all slices below are
    whole, lane-aligned vreg blocks and the output store is lane-dense.
    """

    def kernel(x_ref, w_ref, b_ref, o_ref):
        # z: (TB, N), N = 3P (+P residual slab).  bf16 x bf16 -> f32 on the MXU.
        z = jnp.dot(x_ref[...], w_ref[...], preferred_element_type=jnp.float32)
        z = z + b_ref[...]
        i = jax.nn.sigmoid(z[:, 0 * P:1 * P])
        g = jnp.tanh(z[:, 1 * P:2 * P])
        o = jax.nn.sigmoid(z[:, 2 * P:3 * P])
        h = o * jnp.tanh(i * g)                 # c1 = i*g (c0 == 0 -> forget gate exact no-op)
        if use_residual:
            h = h + z[:, 3 * P:4 * P]           # residual (proj or identity) folded into W
        o_ref[...] = h.astype(o_ref.dtype)

    return kernel


def make_delta_params(seq_weight, w_ih, b_ih, b_hh,
                      proj_w=None, proj_b=None, use_residual=True,
                      compute_dtype=jnp.bfloat16):
    """One-time fusion of all Delta parameters into (W_comb, b_comb).

    Returns W_comb: (K_pad, N) in `compute_dtype`, b_comb: (1, N) f32, with
    N = 3P (+P if residual), P = round_up(H, 128), K_pad = round_up(S*D, 128).
    Column layout: [i | g | o | residual], each slab zero-padded to P lanes.
    The forget gate and recurrent weights w_hh are dropped exactly because
    h0 == c0 == 0 for the single timestep.
    """
    H = w_ih.shape[0] // 4
    D = w_ih.shape[1]
    S = seq_weight.shape[0]
    P = _round_up(H, 128)

    def pad_cols(w):                                   # (D, H) -> (D, P)
        return jnp.pad(w.astype(jnp.float32), ((0, 0), (0, P - H)))

    def pad_bias(b):                                   # (H,) -> (P,)
        return jnp.pad(b.astype(jnp.float32), (0, P - H))

    # Per-gate (D, H) slabs, PyTorch gate order i, f, g, o (f skipped).
    Wi = w_ih[0 * H:1 * H, :].T
    Wg = w_ih[2 * H:3 * H, :].T
    Wo = w_ih[3 * H:4 * H, :].T
    bias = b_ih + b_hh
    slabs = [pad_cols(Wi), pad_cols(Wg), pad_cols(Wo)]
    b_slabs = [pad_bias(bias[0 * H:1 * H]),
               pad_bias(bias[2 * H:3 * H]),
               pad_bias(bias[3 * H:4 * H])]

    if use_residual:
        if proj_w is not None:
            slabs.append(pad_cols(proj_w.T))                         # (D, P)
            b_slabs.append(pad_bias(proj_b))
        else:
            assert H == D, "identity residual requires outDims == inDims"
            slabs.append(pad_cols(jnp.eye(D, dtype=jnp.float32)))    # delta itself
            b_slabs.append(jnp.zeros((P,), jnp.float32))

    W_fused = jnp.concatenate(slabs, axis=1)                         # (D, N) f32
    # Fold seq_weight (in f32, before the bf16 cast):
    #   x_flat @ W_comb == (sum_s w[s] x[:, s, :]) @ W_fused
    W_comb = (seq_weight.astype(jnp.float32)[:, None, None]
              * W_fused[None, :, :]).reshape(S * D, -1)              # (S*D, N)

    K_pad = _round_up(S * D, 128)                                    # unmasked MXU feed
    if K_pad != S * D:
        W_comb = jnp.pad(W_comb, ((0, K_pad - S * D), (0, 0)))

    b_comb = jnp.concatenate(b_slabs)[None, :]                       # (1, N) f32
    return W_comb.astype(compute_dtype), b_comb, H, P


def _pick_batch_tile(B: int) -> int:
    """Sublane-aligned batch tile; >=2 grid blocks for B>=16 (v7x megacore);
    capped at 256 so the x tile stays bounded for large B / small VMEM."""
    if B < 16:
        return _round_up(B, 8)
    tb = _round_up(-(-B // 2), 8)        # ceil(B/2) rounded to a sublane multiple
    return min(tb, 256)


def delta_forward(x, W_comb, b_comb, H, P, use_residual=True):
    """Delta.forward.  x: (B, seqL, inDims) -> (B, outDims)."""
    B, S, D = x.shape
    K_pad, N = W_comb.shape
    assert K_pad >= S * D and K_pad % 128 == 0

    x_flat = x.reshape(B, S * D)                      # wrapper-side reshape only
    if K_pad != S * D:
        x_flat = jnp.pad(x_flat, ((0, 0), (0, K_pad - S * D)))

    TB = _pick_batch_tile(B)
    B_pad = _round_up(B, TB)
    if B_pad != B:
        x_flat = jnp.pad(x_flat, ((0, B_pad - B), (0, 0)))
    x_flat = x_flat.astype(W_comb.dtype)              # bf16 MXU inputs, f32 accum

    grid = (B_pad // TB,)

    itemsize = jnp.dtype(W_comb.dtype).itemsize
    cost = pl.CostEstimate(
        flops=2 * B_pad * K_pad * N,
        transcendentals=4 * B_pad * P,
        bytes_accessed=(B_pad * K_pad * itemsize          # x
                        + K_pad * N * itemsize            # fused weight
                        + N * 4                           # bias
                        + B_pad * P * 4),                 # out
    )
    # VMEM: x + out double-buffered, resident weight/bias (2x worst case), 2x headroom.
    vmem_need = 2 * (2 * TB * K_pad * itemsize + 2 * K_pad * N * itemsize
                     + 2 * N * 4 + 2 * TB * P * 4)
    vmem_limit = int(min(max(vmem_need, 8 << 20), 48 << 20))

    kernel = make_delta_kernel(P, use_residual)
    out = pl.pallas_call(
        kernel,
        grid=grid,
        in_specs=[
            pl.BlockSpec((TB, K_pad), lambda i: (i, 0)),   # batch tile of flattened x
            pl.BlockSpec((K_pad, N), lambda i: (0, 0)),    # fused weight (VMEM-resident)
            pl.BlockSpec((1, N), lambda i: (0, 0)),        # fused bias row
        ],
        out_specs=pl.BlockSpec((TB, P), lambda i: (i, 0)), # lane-dense padded output
        out_shape=jax.ShapeDtypeStruct((B_pad, P), jnp.float32),
        compiler_params=pltpu.CompilerParams(
            dimension_semantics=("parallel",),
            vmem_limit_bytes=vmem_limit),
        cost_estimate=cost,
    )(x_flat, W_comb, b_comb)
    return out[:B, :H]                                     # strip batch / lane padding


def delta_reference(x, seq_weight, w_ih, w_hh, b_ih, b_hh, proj_w, proj_b, use_residual):
    """Pure-JAX f32 reference matching the PyTorch forward exactly."""
    H = w_ih.shape[0] // 4
    xt = jnp.transpose(x, (0, 2, 1))                 # (B, D, S)
    delta = xt @ seq_weight                          # (B, D)
    gates = delta @ w_ih.T + b_ih + b_hh             # h0 == 0 -> w_hh term vanishes
    i = jax.nn.sigmoid(gates[:, 0 * H:1 * H])
    f = jax.nn.sigmoid(gates[:, 1 * H:2 * H])
    g = jnp.tanh(gates[:, 2 * H:3 * H])
    o = jax.nn.sigmoid(gates[:, 3 * H:4 * H])
    c = f * 0.0 + i * g                              # c0 == 0
    h = o * jnp.tanh(c)
    out = h
    if use_residual:
        res = delta if proj_w is None else delta @ proj_w.T + proj_b
        out = out + res
    return out


def _make_seq_weight(S):
    wnp = np.ones(S, np.float32) / (S / 2.0)
    wnp[: S // 2] *= -1.0
    return jnp.asarray(wnp)


if __name__ == "__main__":
    key = jax.random.PRNGKey(0)
    # bf16 MXU inputs vs f32 reference -> relaxed tolerance.
    RTOL = ATOL = 5e-2

    # ---- case 1: outDims != inDims -> Linear residual projection path ----
    B, S, D, H = 8, 8, 32, 48
    ks = jax.random.split(key, 7)
    bound = 1.0 / np.sqrt(H)
    w_ih = jax.random.uniform(ks[0], (4 * H, D), jnp.float32, -bound, bound)
    w_hh = jax.random.uniform(ks[1], (4 * H, H), jnp.float32, -bound, bound)
    b_ih = jax.random.uniform(ks[2], (4 * H,), jnp.float32, -bound, bound)
    b_hh = jax.random.uniform(ks[3], (4 * H,), jnp.float32, -bound, bound)
    proj_w = jax.random.uniform(ks[4], (H, D), jnp.float32, -bound, bound)
    proj_b = jax.random.uniform(ks[5], (H,), jnp.float32, -bound, bound)
    seq_weight = _make_seq_weight(S)
    x = jax.random.normal(ks[6], (B, S, D), jnp.float32)

    W_comb, b_comb, H_out, P_out = make_delta_params(
        seq_weight, w_ih, b_ih, b_hh, proj_w=proj_w, proj_b=proj_b, use_residual=True)
    out = jax.block_until_ready(
        delta_forward(x, W_comb, b_comb, H_out, P_out, use_residual=True))
    ref = delta_reference(x, seq_weight, w_ih, w_hh, b_ih, b_hh, proj_w, proj_b, True)
    assert out.shape == (B, H)
    np.testing.assert_allclose(np.asarray(out), np.asarray(ref), rtol=RTOL, atol=ATOL)

    # ---- case 2: outDims == inDims -> identity residual (no proj) path ----
    B2, S2, D2 = 8, 8, 32
    H2 = D2
    ks2 = jax.random.split(jax.random.PRNGKey(1), 6)
    bound2 = 1.0 / np.sqrt(H2)
    w_ih2 = jax.random.uniform(ks2[0], (4 * H2, D2), jnp.float32, -bound2, bound2)
    w_hh2 = jax.random.uniform(ks2[1], (4 * H2, H2), jnp.float32, -bound2, bound2)
    b_ih2 = jax.random.uniform(ks2[2], (4 * H2,), jnp.float32, -bound2, bound2)
    b_hh2 = jax.random.uniform(ks2[3], (4 * H2,), jnp.float32, -bound2, bound2)
    seq_weight2 = _make_seq_weight(S2)
    x2 = jax.random.normal(ks2[4], (B2, S2, D2), jnp.float32)

    W_comb2, b_comb2, H_out2, P_out2 = make_delta_params(
        seq_weight2, w_ih2, b_ih2, b_hh2, proj_w=None, proj_b=None, use_residual=True)
    out2 = jax.block_until_ready(
        delta_forward(x2, W_comb2, b_comb2, H_out2, P_out2, use_residual=True))
    ref2 = delta_reference(x2, seq_weight2, w_ih2, w_hh2, b_ih2, b_hh2, None, None, True)
    assert out2.shape == (B2, H2)
    np.testing.assert_allclose(np.asarray(out2), np.asarray(ref2), rtol=RTOL, atol=ATOL)

    # ---- case 3: larger batch exercising the >=2-block grid / batch padding ----
    B3 = 100
    x3 = jax.random.normal(jax.random.PRNGKey(2), (B3, S, D), jnp.float32)
    out3 = jax.block_until_ready(
        delta_forward(x3, W_comb, b_comb, H_out, P_out, use_residual=True))
    ref3 = delta_reference(x3, seq_weight, w_ih, w_hh, b_ih, b_hh, proj_w, proj_b, True)
    assert out3.shape == (B3, H)
    np.testing.assert_allclose(np.asarray(out3), np.asarray(ref3), rtol=RTOL, atol=ATOL)

    print("KERNEL_OK")
</pallas_src>

<mosaic_0001>
module attributes {stable_mosaic.version = 11 : i64} {
  func.func @kernel(%arg0: i32, %arg1: memref<8x256xbf16, #tpu.memory_space<vmem>>, %arg2: memref<256x512xbf16, #tpu.memory_space<vmem>>, %arg3: memref<1x512xf32, #tpu.memory_space<vmem>>, %arg4: memref<8x128xf32, #tpu.memory_space<vmem>>) attributes {dimension_semantics = [#tpu.dimension_semantics<parallel>], iteration_bounds = array<i64: 1>, scalar_prefetch = 0 : i64, scratch_operands = 0 : i64, tpu.core_type = #tpu.core_type<tc>, window_params = [{transform_indices = @transform_0, window_bounds = array<i64: 8, 256>}, {pipeline_mode = #tpu.pipeline_mode<synchronous>, transform_indices = @transform_1, window_bounds = array<i64: 256, 512>}, {pipeline_mode = #tpu.pipeline_mode<synchronous>, transform_indices = @transform_2, window_bounds = array<i64: 1, 512>}, {transform_indices = @transform_3, window_bounds = array<i64: 8, 128>}]} {
    %c0 = arith.constant 0 : index
    %c0_0 = arith.constant 0 : index
    %0 = vector.load %arg1[%c0, %c0_0] : memref<8x256xbf16, #tpu.memory_space<vmem>>, vector<8x256xbf16>
    %c0_1 = arith.constant 0 : index
    %c0_2 = arith.constant 0 : index
    %1 = vector.load %arg2[%c0_1, %c0_2] : memref<256x512xbf16, #tpu.memory_space<vmem>>, vector<256x512xbf16>
    %cst = arith.constant dense<0.000000e+00> : vector<8x512xf32>
    %2 = tpu.matmul %0, %1, %cst {dimension_numbers = #tpu.dot_dimension_numbers<[1], [0], [0], [1], [0, 0, 1, 1], [], []>} : vector<8x256xbf16>, vector<256x512xbf16>, vector<8x512xf32> -> vector<8x512xf32>
    %c0_3 = arith.constant 0 : index
    %c0_4 = arith.constant 0 : index
    %3 = vector.load %arg3[%c0_3, %c0_4] : memref<1x512xf32, #tpu.memory_space<vmem>>, vector<1x512xf32>
    %4 = vector.broadcast %3 : vector<1x512xf32> to vector<8x512xf32>
    %5 = arith.addf %2, %4 : vector<8x512xf32>
    %6 = vector.extract_strided_slice %5 {offsets = [0, 0], sizes = [8, 128], strides = [1, 1]} : vector<8x512xf32> to vector<8x128xf32>
    %7 = arith.negf %6 : vector<8x128xf32>
    %8 = math.exp %7 : vector<8x128xf32>
    %cst_5 = arith.constant 1.000000e+00 : f32
    %9 = vector.broadcast %cst_5 : f32 to vector<8x128xf32>
    %10 = arith.addf %9, %8 : vector<8x128xf32>
    %11 = arith.divf %9, %10 : vector<8x128xf32>
    %12 = vector.extract_strided_slice %5 {offsets = [0, 128], sizes = [8, 128], strides = [1, 1]} : vector<8x512xf32> to vector<8x128xf32>
    %13 = math.tanh %12 : vector<8x128xf32>
    %14 = vector.extract_strided_slice %5 {offsets = [0, 256], sizes = [8, 128], strides = [1, 1]} : vector<8x512xf32> to vector<8x128xf32>
    %15 = arith.negf %14 : vector<8x128xf32>
    %16 = math.exp %15 : vector<8x128xf32>
    %cst_6 = arith.constant 1.000000e+00 : f32
    %17 = vector.broadcast %cst_6 : f32 to vector<8x128xf32>
    %18 = arith.addf %17, %16 : vector<8x128xf32>
    %19 = arith.divf %17, %18 : vector<8x128xf32>
    %20 = arith.mulf %11, %13 : vector<8x128xf32>
    %21 = math.tanh %20 : vector<8x128xf32>
    %22 = arith.mulf %19, %21 : vector<8x128xf32>
    %23 = vector.extract_strided_slice %5 {offsets = [0, 384], sizes = [8, 128], strides = [1, 1]} : vector<8x512xf32> to vector<8x128xf32>
    %24 = arith.addf %22, %23 : vector<8x128xf32>
    %c0_7 = arith.constant 0 : index
    %c0_8 = arith.constant 0 : index
    %25 = vector.load %arg4[%c0_7, %c0_8] : memref<8x128xf32, #tpu.memory_space<vmem>>, vector<8x128xf32>
    tpu.vector_store %arg4[%c0_7, %c0_8], %24 {strides = array<i32>} : memref<8x128xf32, #tpu.memory_space<vmem>>, vector<8x128xf32>,
    return
  }
  func.func @transform_0(%arg0: i32) -> (i32, i32) {
    %c0_i32 = arith.constant 0 : i32
    %c0_i32_0 = arith.constant 0 : i32
    return %arg0, %c0_i32 : i32, i32
  }
  func.func @transform_1(%arg0: i32) -> (i32, i32) {
    %c0_i32 = arith.constant 0 : i32
    %c0_i32_0 = arith.constant 0 : i32
    %c0_i32_1 = arith.constant 0 : i32
    return %c0_i32, %c0_i32_0 : i32, i32
  }
  func.func @transform_2(%arg0: i32) -> (i32, i32) {
    %c0_i32 = arith.constant 0 : i32
    %c0_i32_0 = arith.constant 0 : i32
    %c0_i32_1 = arith.constant 0 : i32
    return %c0_i32, %c0_i32_0 : i32, i32
  }
  func.func @transform_3(%arg0: i32) -> (i32, i32) {
    %c0_i32 = arith.constant 0 : i32
    %c0_i32_0 = arith.constant 0 : i32
    return %arg0, %c0_i32 : i32, i32
  }
}

</mosaic_0001>

<bundles_post_ra>
// kernel: tpu_custom_call.1
= control target key start
LH: loop header
LB: loop body
LE: loop exit
PB: predicated region body
PF: predicated region fallthrough
CT: control target
= control target key end

     0   :  { %8 = vsyncpa [#allocation3], 0  ;;  %s897_s0 = inlined_call_operand.hbm [shape: bf16[8,256], index: 0, kind: input, shape index: {}]   ;;  %s898_s1 = inlined_call_operand.hbm [shape: bf16[256,512], index: 1, kind: input, shape index: {}]   ;;  %s899_s2 = inlined_call_operand.vmem [shape: f32[1,512], index: 2, kind: input, shape index: {}]   ;;  %s900_s3 = inlined_call_operand.hbm [shape: f32[8,128], index: 3, kind: output, shape index: {}]  }
   0x1   :  { %9 = vsyncpa [#allocation6], 0 }
   0x2   :  { %10 = vsyncpa [#allocation4], 0  ;;  %s826_s12 = smov [#allocation2]   ;;  %s827_s14 = smov [#allocation5]  }
   0x3   :  { %s17_s13 = sshll.u32 %s826_s12, 4  ;;  %s26_s15 = sshll.u32 %s827_s14, 4  ;;  %s18_s13 = int_to_ptr.vmem [resolvable:$true] %s17_s13  ;;  %s851_s15 = int_to_ptr.vmem [resolvable:$true] %s26_s15 }
   0x4   :  { %s754_s18 = scalar_lea.hbm %s897_s0, 128 }
   0x5   :  { %p755_p0 = scmp.ne.s32.totalorder %s897_s0, %s754_s18  ;;  %p758_p1 = scmp.lt.u32.totalorder %s754_s18, %s897_s0 }
   0x7   :  { %p760_p2 = pnand %p758_p1, %p755_p0 }
   0x9   :  { %763 = shalt.err (!%p760_p2)
}
   0xa   :  { %s764_s23 = scalar_lea.vmem %s18_s13, 128  ;;  %p769_p4 = scmp.lt.s32.totalorder %s18_s13, %s18_s13 }
   0xb   :  { %p765_p3 = scmp.ne.s32.totalorder %s18_s13, %s764_s23  ;;  %p770_p5 = scmp.lt.s32.totalorder %s764_s23, %s764_s23 }
   0xd   :  { %p771_p6 = por %p770_p5, %p769_p4 }
   0xf   :  { %p772_p7 = pnand %p771_p6, %p765_p3 }
  0x11   :  { %775 = shalt.err (!%p772_p7)
}
  0x12   :  { %20 = dma.hbm_to_vmem [thread:$0]  %s897_s0, 128, %s18_s13, [#allocation3]  }
  0x13   :  { %s776_s28 = scalar_lea.hbm %s898_s1, 8192 }
  0x14   :  { %p777_p8 = scmp.ne.s32.totalorder %s898_s1, %s776_s28  ;;  %p780_p9 = scmp.lt.u32.totalorder %s776_s28, %s898_s1 }
  0x16   :  { %p782_p10 = pnand %p780_p9, %p777_p8 }
  0x18   :  { %785 = shalt.err (!%p782_p10)
}
  0x19   :  { %s786_s6 = scalar_lea.vmem %s851_s15, 8192  ;;  %p791_p12 = scmp.lt.s32.totalorder %s851_s15, %s851_s15 }
  0x1a   :  { %p787_p11 = scmp.ne.s32.totalorder %s851_s15, %s786_s6  ;;  %p792_p13 = scmp.lt.s32.totalorder %s786_s6, %s786_s6 }
  0x1c   :  { %p793_p0 = por %p792_p13, %p791_p12 }
  0x1e   :  { %p794_p1 = pnand %p793_p0, %p787_p11 }
  0x20   :  { %797 = shalt.err (!%p794_p1)
}
  0x21   :  { %s828_s0 = smov 256   ;;  %s829_s7 = smov 16  }
  0x22   :  { %32 = dma.hbm_to_vmem [thread:$0]  %s898_s1, 8192, %s851_s15, [#allocation6], %s828_s0, %s828_s0, %s829_s7  }
  0x23   :  { %820 = dma.done.wait [#allocation3], 128  }
  0x24   :  { %821 = vsyncadd [#allocation3], 4294967168 }
  0x25   :  { %822 = dma.done.wait [#allocation6], 8192  }
  0x26   :  { %823 = vsyncadd [#allocation6], 4294959104  ;;  %v644_v0 = vld [vmem:[#allocation5 + $0x4] ss:$16 sps:$4 sm:$0xff]   ;;  %v646_v1 = vld [vmem:[#allocation5] ss:$16 sps:$4 sm:$0xff]  }
  0x27   :  { %455 = vmatprep.subr.bf16.mxu0 %v644_v0  ;;  %v647_v2 = vld [vmem:[#allocation5 + $0x24] ss:$16 sps:$4 sm:$0xff]   ;;  %v649_v3 = vld [vmem:[#allocation5 + $0x20] ss:$16 sps:$4 sm:$0xff]   ;;  %v653_v5 = vld [vmem:[#allocation5 + $0xc] ss:$16 sps:$4 sm:$0xff]  }
  0x28   :  { %456 = vmatpush1.bf16.msra.mxu0 %v646_v1  ;;  %v650_v4 = vld [vmem:[#allocation5 + $0x44] ss:$16 sps:$4 sm:$0xff]   ;;  %v655_v6 = vld [vmem:[#allocation5 + $0x8] ss:$16 sps:$4 sm:$0xff]   ;;  %v652_v7 = vld [vmem:[#allocation5 + $0x40] ss:$16 sps:$4 sm:$0xff]   ;;  %496 = vmatprep.subr.bf16.mxu1 %v653_v5 }
  0x29   :  { %457 = vmatprep.subr.bf16.mxu0 %v647_v2  ;;  %497 = vmatpush1.bf16.msra.mxu1 %v655_v6  ;;  %v659_v8 = vld [vmem:[#allocation5 + $0x2c] ss:$16 sps:$4 sm:$0xff]   ;;  %v661_v9 = vld [vmem:[#allocation5 + $0x28] ss:$16 sps:$4 sm:$0xff]   ;;  %v656_v10 = vld [vmem:[#allocation5 + $0x64] ss:$16 sps:$4 sm:$0xff]  }
  0x2a   :  { %498 = vmatprep.subr.bf16.mxu1 %v659_v8  ;;  %v658_v11 = vld [vmem:[#allocation5 + $0x60] ss:$16 sps:$4 sm:$0xff]   ;;  %v665_v12 = vld [vmem:[#allocation5 + $0x4c] ss:$16 sps:$4 sm:$0xff]   ;;  %v662_v13 = vld [vmem:[#allocation5 + $0x84] ss:$16 sps:$4 sm:$0xff]  }
  0x2b   :  { %v667_v14 = vld [vmem:[#allocation5 + $0x48] ss:$16 sps:$4 sm:$0xff]   ;;  %v671_v15 = vld [vmem:[#allocation5 + $0x6c] ss:$16 sps:$4 sm:$0xff]   ;;  %v664_v16 = vld [vmem:[#allocation5 + $0x80] ss:$16 sps:$4 sm:$0xff]  }
  0x2c   :  { %458 = vmatpush1.bf16.msra.mxu0 %v649_v3  ;;  %v668_v17 = vld [vmem:[#allocation5 + $0xa4] ss:$16 sps:$4 sm:$0xff]   ;;  %v673_v18 = vld [vmem:[#allocation5 + $0x68] ss:$16 sps:$4 sm:$0xff]   ;;  %v677_v19 = vld [vmem:[#allocation5 + $0x8c] ss:$16 sps:$4 sm:$0xff]   ;;  %v108_v3 = vlaneseq }
  0x2d   :  { %459 = vmatprep.subr.bf16.mxu0 %v650_v4  ;;  %499 = vmatpush1.bf16.msra.mxu1 %v661_v9  ;;  %v670_v20 = vld [vmem:[#allocation5 + $0xa0] ss:$16 sps:$4 sm:$0xff]   ;;  %v674_v21 = vld [vmem:[#allocation5 + $0xc4] ss:$16 sps:$4 sm:$0xff]   ;;  %v679_v22 = vld [vmem:[#allocation5 + $0x88] ss:$16 sps:$4 sm:$0xff]  }
  0x2e   :  { %500 = vmatprep.subr.bf16.mxu1 %v665_v12  ;;  %v683_v23 = vld [vmem:[#allocation5 + $0xac] ss:$16 sps:$4 sm:$0xff]   ;;  %v676_v24 = vld [vmem:[#allocation5 + $0xc0] ss:$16 sps:$4 sm:$0xff]   ;;  %v680_v25 = vld [vmem:[#allocation5 + $0xe4] ss:$16 sps:$4 sm:$0xff]  }
  0x2f   :  { %v685_v26 = vld [vmem:[#allocation5 + $0xa8] ss:$16 sps:$4 sm:$0xff]   ;;  %v689_v27 = vld [vmem:[#allocation5 + $0xcc] ss:$16 sps:$4 sm:$0xff]   ;;  %v682_v28 = vld [vmem:[#allocation5 + $0xe0] ss:$16 sps:$4 sm:$0xff]  }
  0x30   :  { %460 = vmatpush1.bf16.msra.mxu0 %v652_v7  ;;  %v686_v29 = vld [vmem:[#allocation5 + $0x104] ss:$16 sps:$4 sm:$0xff]   ;;  %v691_v30 = vld [vmem:[#allocation5 + $0xc8] ss:$16 sps:$4 sm:$0xff]   ;;  %v695_v31 = vld [vmem:[#allocation5 + $0xec] ss:$16 sps:$4 sm:$0xff]  }
  0x31   :  { %461 = vmatprep.subr.bf16.mxu0 %v656_v10  ;;  %501 = vmatpush1.bf16.msra.mxu1 %v667_v14  ;;  %v688_v32 = vld [vmem:[#allocation5 + $0x100] ss:$16 sps:$4 sm:$0xff]   ;;  %v692_v33 = vld [vmem:[#allocation5 + $0x124] ss:$16 sps:$4 sm:$0xff]   ;;  %v697_v34 = vld [vmem:[#allocation5 + $0xe8] ss:$16 sps:$4 sm:$0xff]  }
  0x32   :  { %502 = vmatprep.subr.bf16.mxu1 %v671_v15  ;;  %v701_v35 = vld [vmem:[#allocation5 + $0x10c] ss:$16 sps:$4 sm:$0xff]   ;;  %v694_v36 = vld [vmem:[#allocation5 + $0x120] ss:$16 sps:$4 sm:$0xff]   ;;  %v698_v37 = vld [vmem:[#allocation5 + $0x144] ss:$16 sps:$4 sm:$0xff]  }
  0x33   :  { %v703_v38 = vld [vmem:[#allocation5 + $0x108] ss:$16 sps:$4 sm:$0xff]   ;;  %v707_v39 = vld [vmem:[#allocation5 + $0x12c] ss:$16 sps:$4 sm:$0xff]   ;;  %v700_v40 = vld [vmem:[#allocation5 + $0x140] ss:$16 sps:$4 sm:$0xff]  }
  0x34   :  { %462 = vmatpush1.bf16.msra.mxu0 %v658_v11  ;;  %v704_v41 = vld [vmem:[#allocation5 + $0x164] ss:$16 sps:$4 sm:$0xff]   ;;  %v709_v42 = vld [vmem:[#allocation5 + $0x128] ss:$16 sps:$4 sm:$0xff]   ;;  %v713_v44 = vld [vmem:[#allocation5 + $0x14c] ss:$16 sps:$4 sm:$0xff]  }
  0x35   :  { %463 = vmatprep.subr.bf16.mxu0 %v662_v13  ;;  %503 = vmatpush1.bf16.msra.mxu1 %v673_v18  ;;  %v41_v43 = vld [vmem:[#allocation2] sm:$0xff]  ;;  %v706_v46 = vld [vmem:[#allocation5 + $0x160] ss:$16 sps:$4 sm:$0xff]   ;;  %v710_v48 = vld [vmem:[#allocation5 + $0x184] ss:$16 sps:$4 sm:$0xff]   ;;  %v109_v4 = vshrl.u32 %v108_v3, 7 }
  0x36   :  { %504 = vmatprep.subr.bf16.mxu1 %v677_v19  ;;  %v572_v45 = vcombine.high %v41_v43, %v41_v43  ;;  %v715_v47 = vld [vmem:[#allocation5 + $0x148] ss:$16 sps:$4 sm:$0xff]   ;;  %v719_v49 = vld [vmem:[#allocation5 + $0x16c] ss:$16 sps:$4 sm:$0xff]   ;;  %v712_v50 = vld [vmem:[#allocation5 + $0x180] ss:$16 sps:$4 sm:$0xff]   ;;  %v571_v1 = vcombine.low %v41_v43, %v41_v43 }
  0x37   :  { %v721_v51 = vld [vmem:[#allocation5 + $0x168] ss:$16 sps:$4 sm:$0xff]   ;;  %v716_v52 = vld [vmem:[#allocation5 + $0x1a4] ss:$16 sps:$4 sm:$0xff]   ;;  %v725_v53 = vld [vmem:[#allocation5 + $0x18c] ss:$16 sps:$4 sm:$0xff]  }
  0x38   :  { %464 = vmatpush1.bf16.msra.mxu0 %v664_v16  ;;  %487 = vmatprep.mubr.bf16.mxu0 %v572_v45  ;;  %v718_v54 = vld [vmem:[#allocation5 + $0x1a0] ss:$16 sps:$4 sm:$0xff]   ;;  %v727_v55 = vld [vmem:[#allocation5 + $0x188] ss:$16 sps:$4 sm:$0xff]   ;;  %v722_v56 = vld [vmem:[#allocation5 + $0x1c4] ss:$16 sps:$4 sm:$0xff]  }
  0x39   :  { %465 = vmatprep.subr.bf16.mxu0 %v668_v17  ;;  %505 = vmatpush1.bf16.msra.mxu1 %v679_v22  ;;  %v731_v57 = vld [vmem:[#allocation5 + $0x1ac] ss:$16 sps:$4 sm:$0xff]   ;;  %v724_v58 = vld [vmem:[#allocation5 + $0x1c0] ss:$16 sps:$4 sm:$0xff]   ;;  %v735_v59 = vld [vmem:[#allocation5 + $0x1a8] ss:$16 sps:$4 sm:$0xff]  }
  0x3a   :  { %506 = vmatprep.subr.bf16.mxu1 %v683_v23  ;;  %528 = vmatprep.mubr.bf16.mxu1 %v572_v45  ;;  %v728_v60 = vld [vmem:[#allocation5 + $0x1e4] ss:$16 sps:$4 sm:$0xff]   ;;  %v736_v61 = vld [vmem:[#allocation5 + $0x1cc] ss:$16 sps:$4 sm:$0xff]   ;;  %v730_v62 = vld [vmem:[#allocation5 + $0x1e0] ss:$16 sps:$4 sm:$0xff]  }
  0x3b   :  { %v738_v63 = vld [vmem:[#allocation5 + $0x1c8] ss:$16 sps:$4 sm:$0xff]   ;;  %v739_v0 = vld [vmem:[#allocation5 + $0x1ec] ss:$16 sps:$4 sm:$0xff]   ;;  %v110_v5 = vsub.s32 0, %v109_v4  ;;  %v118_v8 = vsub.s32 2, %v109_v4 }
  0x3c   :  { %466 = vmatpush1.bf16.msra.mxu0 %v670_v20  ;;  %v741_v2 = vld [vmem:[#allocation5 + $0x1e8] ss:$16 sps:$4 sm:$0xff]   ;;  %v114_v17 = vsub.s32 1, %v109_v4 }
  0x3d   :  { %467 = vmatprep.subr.bf16.mxu0 %v674_v21  ;;  %507 = vmatpush1.bf16.msra.mxu1 %v685_v26  ;;  %v106_v6 = vld [vmem:[%s899_s2] sm:$0xf]  ;;  %s830_s2 = smov [#allocation7]  }
  0x3e   :  { %508 = vmatprep.subr.bf16.mxu1 %v689_v27  ;;  %v111_v7 = vrot.slane %v106_v6, %v110_v5  ;;  %v119_v12 = vrot.slane %v106_v6, %v118_v8  ;;  %v115_v23 = vrot.slane %v106_v6, %v114_v17  ;;  %s561_s11 = sshll.u32 %s830_s2, 4  ;;  %s562_s11 = int_to_ptr.vmem [resolvable:$true] %s561_s11 }
  0x3f   :  { %s798_s12 = scalar_lea.vmem %s562_s11, 128  ;;  %p803_p3 = scmp.lt.s32.totalorder %s562_s11, %s562_s11 }
  0x40   :  { %468 = vmatpush1.bf16.msra.mxu0 %v676_v24  ;;  %p799_p2 = scmp.ne.s32.totalorder %s562_s11, %s798_s12  ;;  %p804_p4 = scmp.lt.s32.totalorder %s798_s12, %s798_s12 }
  0x41   :  { %469 = vmatprep.subr.bf16.mxu0 %v680_v25  ;;  %509 = vmatpush1.bf16.msra.mxu1 %v691_v30 }
  0x42   :  { %510 = vmatprep.subr.bf16.mxu1 %v695_v31  ;;  %p805_p5 = por %p804_p4, %p803_p3 }
  0x44   :  { %470 = vmatpush1.bf16.msra.mxu0 %v682_v28  ;;  %p806_p6 = pnand %p805_p5, %p799_p2 }
  0x45   :  { %471 = vmatprep.subr.bf16.mxu0 %v686_v29  ;;  %511 = vmatpush1.bf16.msra.mxu1 %v697_v34 }
  0x46   :  { %512 = vmatprep.subr.bf16.mxu1 %v701_v35 }
  0x48   :  { %472 = vmatpush1.bf16.msra.mxu0 %v688_v32  ;;  %v122_v32 = vsub.s32 3, %v109_v4 }
  0x49   :  { %473 = vmatprep.subr.bf16.mxu0 %v692_v33  ;;  %513 = vmatpush1.bf16.msra.mxu1 %v703_v38 }
  0x4a   :  { %514 = vmatprep.subr.bf16.mxu1 %v707_v39  ;;  %v123_v33 = vrot.slane %v106_v6, %v122_v32 }
  0x4c   :  { %474 = vmatpush1.bf16.msra.mxu0 %v694_v36 }
  0x4d   :  { %475 = vmatprep.subr.bf16.mxu0 %v698_v37  ;;  %515 = vmatpush1.bf16.msra.mxu1 %v709_v42 }
  0x4e   :  { %516 = vmatprep.subr.bf16.mxu1 %v713_v44 }
  0x50   :  { %476 = vmatpush1.bf16.msra.mxu0 %v700_v40 }
  0x51   :  { %477 = vmatprep.subr.bf16.mxu0 %v704_v41  ;;  %517 = vmatpush1.bf16.msra.mxu1 %v715_v47 }
  0x52   :  { %518 = vmatprep.subr.bf16.mxu1 %v719_v49 }
  0x54   :  { %478 = vmatpush1.bf16.msra.mxu0 %v706_v46 }
  0x55   :  { %479 = vmatprep.subr.bf16.mxu0 %v710_v48  ;;  %519 = vmatpush1.bf16.msra.mxu1 %v721_v51 }
  0x56   :  { %520 = vmatprep.subr.bf16.mxu1 %v725_v53 }
  0x58   :  { %480 = vmatpush1.bf16.msra.mxu0 %v712_v50 }
  0x59   :  { %481 = vmatprep.subr.bf16.mxu0 %v716_v52  ;;  %521 = vmatpush1.bf16.msra.mxu1 %v727_v55 }
  0x5a   :  { %522 = vmatprep.subr.bf16.mxu1 %v731_v57 }
  0x5c   :  { %482 = vmatpush1.bf16.msra.mxu0 %v718_v54 }
  0x5d   :  { %483 = vmatprep.subr.bf16.mxu0 %v722_v56  ;;  %523 = vmatpush1.bf16.msra.mxu1 %v735_v59 }
  0x5e   :  { %524 = vmatprep.subr.bf16.mxu1 %v736_v61 }
  0x60   :  { %484 = vmatpush1.bf16.msra.mxu0 %v724_v58 }
  0x61   :  { %485 = vmatprep.subr.bf16.mxu0 %v728_v60  ;;  %525 = vmatpush1.bf16.msra.mxu1 %v738_v63 }
  0x62   :  { %526 = vmatprep.subr.bf16.mxu1 %v739_v0 }
  0x64   :  { %486 = vmatpush1.bf16.msra.mxu0 %v730_v62 }
  0x65   :  { %527 = vmatpush1.bf16.msra.mxu1 %v741_v2 }
  0x67   :  { %488 = vmatmul.mubr.bf16.vlgmr.msra.gmra.mrb[0].mxu0 %v571_v1 }
  0x68   :  { %529 = vmatmul.mubr.bf16.vlgmr.msra.gmra.mrb[0].mxu1 %v571_v1 }
 0x13a   :  { %v489_v9 = vpop.f32.mrb[0].mxu0 }
 0x13b   :  { %v490_v10 = vadd.f32 %v489_v9, %v111_v7  ;;  %v491_v11 = vpop.f32.mrb[1].mxu0  ;;  %v530_v16 = vpop.f32.mrb[0].mxu1 }
 0x13c   :  { %v493_v13 = vpop.f32.mrb[2].mxu0  ;;  %v531_v18 = vadd.f32 %v530_v16, %v119_v12  ;;  %v532_v19 = vpop.f32.mrb[1].mxu1  ;;  %v492_v24 = vadd.f32 %v491_v11, %v115_v23 }
 0x13d   :  { %v637_v14 = vmul.f32 -1.442695, %v490_v10  ;;  %v494_v15 = vpop.f32.mrb[3].mxu0  ;;  %v534_v20 = vpop.f32.mrb[2].mxu1  ;;  %v533_v36 = vadd.f32 %v532_v19, %v123_v33 }
 0x13e   :  { %v535_v21 = vpop.f32.mrb[3].mxu1  ;;  %v638_v22 = vmul.f32 -1.442695, %v531_v18 }
 0x13f   :  { %742 = vpow2.f32 %v637_v14 }
 0x140   :  { %744 = vpow2.f32 %v638_v22 }
 0x141   :  { %746 = vtanh.f32 %v492_v24 }
 0x149   :  { %v743_v25 = vpop.eup %742 }
 0x14a   :  { %v540_v26 = vadd.f32 1.0, %v743_v25  ;;  %v745_v27 = vpop.eup %744 }
 0x14b   :  { %v547_v28 = vadd.f32 1.0, %v745_v27  ;;  %v747_v29 = vpop.eup %746 }
 0x14c   :  { %748 = vrcp.f32 %v540_v26 }
 0x14d   :  { %750 = vrcp.f32 %v547_v28 }
 0x156   :  { %v749_v30 = vpop.eup %748 }
 0x157   :  { %v550_v31 = vmul.f32 %v749_v30, %v747_v29  ;;  %v751_v34 = vpop.eup %750 }
 0x159   :  { %752 = vtanh.f32 %v550_v31 }
 0x163   :  { %v753_v35 = vpop.eup %752 }
 0x164   :  { %v552_v37 = vmul.f32 %v753_v35, %v751_v34 }
 0x166   :  { %v553_v38 = vadd.f32 %v552_v37, %v533_v36 }
 0x168   :  { %554 = vst [vmem:[#allocation7] sm:$0xff] %v553_v38 }
 0x169   :  { %809 = shalt.err (!%p806_p6)
}
 0x16a   :  { %s810_s15 = scalar_lea.hbm %s900_s3, 128 }
 0x16b   :  { %p811_p7 = scmp.ne.s32.totalorder %s900_s3, %s810_s15  ;;  %p814_p8 = scmp.lt.u32.totalorder %s810_s15, %s900_s3 }
 0x16d   :  { %p816_p9 = pnand %p814_p8, %p811_p7 }
 0x16f   :  { %819 = shalt.err (!%p816_p9)
}
 0x170   :  { %564 = dma.vmem_to_hbm [thread:$0]  %s562_s11, 128, %s900_s3, [#allocation4]  }
 0x171   :  { %824 = dma.done.wait [#allocation4], 128  }
 0x172   :  { %825 = vsyncadd [#allocation4], 4294967168 }
 0x173   :  { %568 = vsyncpa [#allocation3], 1 }
 0x174   :  { %569 = vsyncpa [#allocation6], 1 }
 0x175   :  { %570 = vsyncpa [#allocation4], 1 }

</bundles_post_ra>
